<compile_context>
chip_gen: v7x
topology: tpu7x:2x2x1
jax: 0.10.0
libtpu: 0.0.40
codegen_flags: <defaults>
</compile_context>

<pallas_src>
import jax
import jax.numpy as jnp
from jax.experimental import pallas as pl
from jax.experimental.pallas import tpu as pltpu


def _cdiv(a, b):
    return -(-a // b)


def _round_up(a, b):
    return _cdiv(a, b) * b


def _wnll_kernel(pred_ref, tgt_ref, cls_ref, w_ref, out_ref):
    # pred_ref: (T, L) log-probabilities in the input dtype, L = PACK*C (lane-dense)
    # tgt_ref : (T, L) int8/int32 per-lane target class id (-1 for padded samples)
    # cls_ref : (1, L) int8/int32 per-lane class-id pattern [0..C-1, 0..C-1, ...]
    # w_ref   : (1, L) f32 per-lane class weight (weight tiled PACK times)
    # out_ref : (8, L) f32 per-split accumulator; row 0 = sum w*pred, row 1 = sum w
    t = pl.program_id(1)

    @pl.when(t == 0)
    def _():
        out_ref[...] = jnp.zeros_like(out_ref)

    pred = pred_ref[...].astype(jnp.float32)
    match = tgt_ref[...].astype(jnp.int32) == cls_ref[...].astype(jnp.int32)
    wmask = jnp.where(match, w_ref[...], 0.0)        # weight[target_i] at the picked lane

    # no negate in the hot path; the wrapper applies the sign at the end
    out_ref[0:1, :] += jnp.sum(wmask * pred, axis=0, keepdims=True)
    out_ref[1:2, :] += jnp.sum(wmask, axis=0, keepdims=True)


def get_loss_pallas(pred, target, trans_feat, weight, *, tile_rows=4096, num_splits=2):
    """Weighted NLL loss (mean reduction), matching F.nll_loss(pred, target, weight=weight)."""
    del trans_feat  # unused by the forward pass, same as the PyTorch module
    n, c = pred.shape

    # ---- lane-dense packing parameters --------------------------------------------------
    pack = max(1, 128 // c) if c <= 128 else 1       # samples per packed row
    lanes = pack * c                                 # packed row width (128 when C | 128)
    idx_dtype = jnp.int8 if c <= 127 else jnp.int32

    # ---- grid sizing over packed rows (row tiles kept multiples of 32) ------------------
    rows = _cdiv(n, pack)
    num_splits = max(1, min(num_splits, _cdiv(rows, 32)))   # don't over-split tiny inputs
    rows_per_split = _round_up(_cdiv(rows, num_splits), 32)
    tile = min(_round_up(tile_rows, 32), rows_per_split)
    rows_per_split = _round_up(rows_per_split, tile)
    n_tiles = rows_per_split // tile
    rows_padded = rows_per_split * num_splits
    n_padded = rows_padded * pack

    # ---- wrapper-side repacking (cheap XLA pads/reshapes; no transpose of pred) ---------
    pred_packed = jnp.pad(pred, ((0, n_padded - n), (0, 0))).reshape(rows_padded, lanes)
    tgt = jnp.pad(target.astype(jnp.int32), (0, n_padded - n), constant_values=-1)
    tgt_lanes = jnp.broadcast_to(tgt[:, None], (n_padded, c))
    tgt_lanes = tgt_lanes.reshape(rows_padded, lanes).astype(idx_dtype)
    cls_row = jnp.tile(jnp.arange(c, dtype=idx_dtype), pack).reshape(1, lanes)
    w_row = jnp.tile(weight.astype(jnp.float32), pack).reshape(1, lanes)

    row_spec = lambda s, t: (s * n_tiles + t, 0)

    partials = pl.pallas_call(
        _wnll_kernel,
        out_shape=jax.ShapeDtypeStruct((num_splits, 8, lanes), jnp.float32),
        grid=(num_splits, n_tiles),
        in_specs=[
            pl.BlockSpec((tile, lanes), row_spec),               # pred (input dtype)
            pl.BlockSpec((tile, lanes), row_spec),               # per-lane target ids
            pl.BlockSpec((1, lanes), lambda s, t: (0, 0)),       # class-id pattern
            pl.BlockSpec((1, lanes), lambda s, t: (0, 0)),       # per-lane weights
        ],
        out_specs=pl.BlockSpec((None, 8, lanes), lambda s, t: (s, 0, 0)),
        compiler_params=pltpu.CompilerParams(
            dimension_semantics=("parallel", "arbitrary")),
    )(pred_packed, tgt_lanes, cls_row, w_row)

    num = jnp.sum(partials[:, 0, :])   # sum_i weight[target_i] * pred[i, target_i]
    den = jnp.sum(partials[:, 1, :])   # sum_i weight[target_i]
    return -num / den


if __name__ == "__main__":
    key = jax.random.PRNGKey(0)
    k1, k2, k3, k4 = jax.random.split(key, 4)

    N, C = 200, 16    # small point batch, 16 classes (exercises lane packing + padding)
    logits = jax.random.normal(k1, (N, C), dtype=jnp.float32)
    pred = jax.nn.log_softmax(logits, axis=-1)                 # log-probs, like the model output
    target = jax.random.randint(k2, (N,), 0, C, dtype=jnp.int32)
    weight = jax.random.uniform(k3, (C,), dtype=jnp.float32, minval=0.5, maxval=1.5)
    trans_feat = jax.random.normal(k4, (8, 3, 3), dtype=jnp.float32)  # unused by forward

    loss = get_loss_pallas(pred, target, trans_feat, weight)
    jax.block_until_ready(loss)

    # reference check in plain JAX (weighted mean NLL)
    picked = pred[jnp.arange(N), target]
    wsel = weight[target]
    ref = jnp.sum(wsel * (-picked)) / jnp.sum(wsel)
    assert jnp.allclose(loss, ref, rtol=1e-5, atol=1e-5), (loss, ref)

    print("KERNEL_OK")
</pallas_src>

<mosaic_0001>
module attributes {stable_mosaic.version = 11 : i64} {
  func.func @_wnll_kernel(%arg0: i32, %arg1: i32, %arg2: memref<32x128xf32, #tpu.memory_space<vmem>>, %arg3: memref<32x128xi8, #tpu.memory_space<vmem>>, %arg4: memref<1x128xi8, #tpu.memory_space<vmem>>, %arg5: memref<1x128xf32, #tpu.memory_space<vmem>>, %arg6: memref<1x8x128xf32, #tpu.memory_space<vmem>>) attributes {dimension_semantics = [#tpu.dimension_semantics<parallel>, #tpu.dimension_semantics<arbitrary>], iteration_bounds = array<i64: 1, 1>, scalar_prefetch = 0 : i64, scratch_operands = 0 : i64, tpu.core_type = #tpu.core_type<tc>, window_params = [{transform_indices = @transform_0, window_bounds = array<i64: 32, 128>}, {transform_indices = @transform_1, window_bounds = array<i64: 32, 128>}, {pipeline_mode = #tpu.pipeline_mode<synchronous>, transform_indices = @transform_2, window_bounds = array<i64: 1, 128>}, {pipeline_mode = #tpu.pipeline_mode<synchronous>, transform_indices = @transform_3, window_bounds = array<i64: 1, 128>}, {transform_indices = @transform_4, window_bounds = array<i64: 1, 8, 128>}]} {
    %c0_i32 = arith.constant 0 : i32
    %0 = arith.cmpi eq, %arg1, %c0_i32 : i32
    %1 = arith.extui %0 : i1 to i32
    %c0_i32_0 = arith.constant 0 : i32
    %2 = arith.cmpi ne, %1, %c0_i32_0 : i32
    scf.if %2 {
      %cst_21 = arith.constant 0.000000e+00 : f32
      %32 = vector.broadcast %cst_21 : f32 to vector<8x128xf32>
      %c0_22 = arith.constant 0 : index
      %c0_23 = arith.constant 0 : index
      %c0_24 = arith.constant 0 : index
      %33 = vector.load %arg6[%c0_22, %c0_23, %c0_24] : memref<1x8x128xf32, #tpu.memory_space<vmem>>, vector<1x8x128xf32>
      %34 = vector.shape_cast %33 : vector<1x8x128xf32> to vector<8x128xf32>
      %35 = vector.shape_cast %32 : vector<8x128xf32> to vector<1x8x128xf32>
      tpu.vector_store %arg6[%c0_22, %c0_23, %c0_24], %35 {strides = array<i32>} : memref<1x8x128xf32, #tpu.memory_space<vmem>>, vector<1x8x128xf32>,
    } else {
    }
    %c0 = arith.constant 0 : index
    %c0_1 = arith.constant 0 : index
    %3 = vector.load %arg2[%c0, %c0_1] : memref<32x128xf32, #tpu.memory_space<vmem>>, vector<32x128xf32>
    %c0_2 = arith.constant 0 : index
    %c0_3 = arith.constant 0 : index
    %4 = vector.load %arg3[%c0_2, %c0_3] : memref<32x128xi8, #tpu.memory_space<vmem>>, vector<32x128xi8>
    %5 = arith.extsi %4 : vector<32x128xi8> to vector<32x128xi32>
    %c0_4 = arith.constant 0 : index
    %c0_5 = arith.constant 0 : index
    %6 = vector.load %arg4[%c0_4, %c0_5] : memref<1x128xi8, #tpu.memory_space<vmem>>, vector<1x128xi8>
    %7 = arith.extsi %6 : vector<1x128xi8> to vector<1x128xi32>
    %8 = vector.broadcast %7 : vector<1x128xi32> to vector<32x128xi32>
    %9 = arith.cmpi eq, %5, %8 : vector<32x128xi32>
    %c0_6 = arith.constant 0 : index
    %c0_7 = arith.constant 0 : index
    %10 = vector.load %arg5[%c0_6, %c0_7] : memref<1x128xf32, #tpu.memory_space<vmem>>, vector<1x128xf32>
    %cst = arith.constant 0.000000e+00 : f32
    %11 = vector.shape_cast %10 : vector<1x128xf32> to vector<1x128xf32>
    %12 = vector.broadcast %11 : vector<1x128xf32> to vector<32x128xf32>
    %13 = vector.broadcast %cst : f32 to vector<32x128xf32>
    %14 = arith.select %9, %12, %13 : vector<32x128xi1>, vector<32x128xf32>
    %c0_8 = arith.constant 0 : index
    %c0_9 = arith.constant 0 : index
    %c0_10 = arith.constant 0 : index
    %15 = vector.load %arg6[%c0_8, %c0_9, %c0_10] : memref<1x8x128xf32, #tpu.memory_space<vmem>>, vector<1x1x128xf32>
    %16 = vector.shape_cast %15 : vector<1x1x128xf32> to vector<1x128xf32>
    %17 = arith.mulf %14, %3 : vector<32x128xf32>
    %cst_11 = arith.constant dense<0.000000e+00> : vector<128xf32>
    %18 = vector.multi_reduction <add>, %17, %cst_11 [0] : vector<32x128xf32> to vector<128xf32>
    %19 = vector.shape_cast %18 : vector<128xf32> to vector<1x128xf32>
    %20 = arith.addf %16, %19 : vector<1x128xf32>
    %c0_12 = arith.constant 0 : index
    %c0_13 = arith.constant 0 : index
    %c0_14 = arith.constant 0 : index
    %21 = vector.load %arg6[%c0_12, %c0_13, %c0_14] : memref<1x8x128xf32, #tpu.memory_space<vmem>>, vector<1x1x128xf32>
    %22 = vector.shape_cast %21 : vector<1x1x128xf32> to vector<1x128xf32>
    %23 = vector.shape_cast %20 : vector<1x128xf32> to vector<1x1x128xf32>
    tpu.vector_store %arg6[%c0_12, %c0_13, %c0_14], %23 {strides = array<i32>} : memref<1x8x128xf32, #tpu.memory_space<vmem>>, vector<1x1x128xf32>,
    %c0_15 = arith.constant 0 : index
    %c1 = arith.constant 1 : index
    %c0_16 = arith.constant 0 : index
    %24 = vector.load %arg6[%c0_15, %c1, %c0_16] : memref<1x8x128xf32, #tpu.memory_space<vmem>>, vector<1x1x128xf32>
    %25 = vector.shape_cast %24 : vector<1x1x128xf32> to vector<1x128xf32>
    %cst_17 = arith.constant dense<0.000000e+00> : vector<128xf32>
    %26 = vector.multi_reduction <add>, %14, %cst_17 [0] : vector<32x128xf32> to vector<128xf32>
    %27 = vector.shape_cast %26 : vector<128xf32> to vector<1x128xf32>
    %28 = arith.addf %25, %27 : vector<1x128xf32>
    %c0_18 = arith.constant 0 : index
    %c1_19 = arith.constant 1 : index
    %c0_20 = arith.constant 0 : index
    %29 = vector.load %arg6[%c0_18, %c1_19, %c0_20] : memref<1x8x128xf32, #tpu.memory_space<vmem>>, vector<1x1x128xf32>
    %30 = vector.shape_cast %29 : vector<1x1x128xf32> to vector<1x128xf32>
    %31 = vector.shape_cast %28 : vector<1x128xf32> to vector<1x1x128xf32>
    tpu.vector_store %arg6[%c0_18, %c1_19, %c0_20], %31 {strides = array<i32>} : memref<1x8x128xf32, #tpu.memory_space<vmem>>, vector<1x1x128xf32>,
    return
  }
  func.func @transform_0(%arg0: i32, %arg1: i32) -> (i32, i32) {
    %c1_i32 = arith.constant 1 : i32
    %0 = arith.muli %arg0, %c1_i32 : i32
    %1 = arith.addi %0, %arg1 : i32
    %c0_i32 = arith.constant 0 : i32
    %c0_i32_0 = arith.constant 0 : i32
    return %1, %c0_i32 : i32, i32
  }
  func.func @transform_1(%arg0: i32, %arg1: i32) -> (i32, i32) {
    %c1_i32 = arith.constant 1 : i32
    %0 = arith.muli %arg0, %c1_i32 : i32
    %1 = arith.addi %0, %arg1 : i32
    %c0_i32 = arith.constant 0 : i32
    %c0_i32_0 = arith.constant 0 : i32
    return %1, %c0_i32 : i32, i32
  }
  func.func @transform_2(%arg0: i32, %arg1: i32) -> (i32, i32) {
    %c0_i32 = arith.constant 0 : i32
    %c0_i32_0 = arith.constant 0 : i32
    %c0_i32_1 = arith.constant 0 : i32
    return %c0_i32, %c0_i32_0 : i32, i32
  }
  func.func @transform_3(%arg0: i32, %arg1: i32) -> (i32, i32) {
    %c0_i32 = arith.constant 0 : i32
    %c0_i32_0 = arith.constant 0 : i32
    %c0_i32_1 = arith.constant 0 : i32
    return %c0_i32, %c0_i32_0 : i32, i32
  }
  func.func @transform_4(%arg0: i32, %arg1: i32) -> (i32, i32, i32) {
    %c0_i32 = arith.constant 0 : i32
    %c0_i32_0 = arith.constant 0 : i32
    %c0_i32_1 = arith.constant 0 : i32
    return %arg0, %c0_i32, %c0_i32_0 : i32, i32, i32
  }
}

</mosaic_0001>

<bundles_post_ra>
// kernel: tpu_custom_call.1
= control target key start
LH: loop header
LB: loop body
LE: loop exit
PB: predicated region body
PF: predicated region fallthrough
CT: control target
= control target key end

     0   :  { %9 = vsyncpa [#allocation3], 0  ;;  %s285_s0 = inlined_call_operand.hbm [shape: f32[32,128], index: 0, kind: input, shape index: {}]   ;;  %s286_s1 = inlined_call_operand.hbm [shape: s8[32,128], index: 1, kind: input, shape index: {}]   ;;  %s287_s2 = inlined_call_operand.vmem [shape: s8[1,128], index: 2, kind: input, shape index: {}]   ;;  %s288_s3 = inlined_call_operand.vmem [shape: f32[1,128], index: 3, kind: input, shape index: {}]   ;;  %s289_s4 = inlined_call_operand.hbm [shape: f32[1,8,128], index: 4, kind: output, shape index: {}]  }
   0x1   :  { %10 = vsyncpa [#allocation6], 0 }
   0x2   :  { %11 = vsyncpa [#allocation4], 0  ;;  %s212_s15 = smov [#allocation2]   ;;  %s140_s19 = scalar_lea.hbm %s285_s0, 512 }
   0x3   :  { %s21_s16 = sshll.u32 %s212_s15, 4  ;;  %p141_p0 = scmp.ne.s32.totalorder %s285_s0, %s140_s19  ;;  %s22_s16 = int_to_ptr.vmem [resolvable:$true] %s21_s16 }
   0x4   :  { %p144_p1 = scmp.lt.u32.totalorder %s140_s19, %s285_s0 }
   0x6   :  { %p146_p2 = pnand %p144_p1, %p141_p0 }
   0x8   :  { %149 = shalt.err (!%p146_p2)
}
   0x9   :  { %s150_s24 = scalar_lea.vmem %s22_s16, 512  ;;  %p155_p4 = scmp.lt.s32.totalorder %s22_s16, %s22_s16 }
   0xa   :  { %p151_p3 = scmp.ne.s32.totalorder %s22_s16, %s150_s24  ;;  %p156_p5 = scmp.lt.s32.totalorder %s150_s24, %s150_s24 }
   0xc   :  { %p157_p6 = por %p156_p5, %p155_p4 }
   0xe   :  { %p158_p7 = pnand %p157_p6, %p151_p3 }
  0x10   :  { %161 = shalt.err (!%p158_p7)
}
  0x11   :  { %s213_s25 = smov 128   ;;  %s214_s26 = smov 8  }
  0x12   :  { %27 = dma.hbm_to_vmem [thread:$0]  %s285_s0, 512, %s22_s16, [#allocation3], %s213_s25, %s213_s25, %s214_s26  }
  0x13   :  { %s215_s29 = smov [#allocation5]   ;;  %s162_s7 = scalar_lea.hbm %s286_s1, 128 }
  0x14   :  { %s37_s30 = sshll.u32 %s215_s29, 4  ;;  %p163_p8 = scmp.ne.s32.totalorder %s286_s1, %s162_s7  ;;  %s38_s30 = int_to_ptr.vmem [resolvable:$true] %s37_s30 }
  0x15   :  { %p166_p9 = scmp.lt.u32.totalorder %s162_s7, %s286_s1 }
  0x17   :  { %p168_p10 = pnand %p166_p9, %p163_p8 }
  0x19   :  { %171 = shalt.err (!%p168_p10)
}
  0x1a   :  { %s172_s12 = scalar_lea.vmem %s38_s30, 128  ;;  %p177_p12 = scmp.lt.s32.totalorder %s38_s30, %s38_s30 }
  0x1b   :  { %p173_p11 = scmp.ne.s32.totalorder %s38_s30, %s172_s12  ;;  %p178_p13 = scmp.lt.s32.totalorder %s172_s12, %s172_s12 }
  0x1d   :  { %p179_p0 = por %p178_p13, %p177_p12 }
  0x1f   :  { %p180_p1 = pnand %p179_p0, %p173_p11 }
  0x21   :  { %183 = shalt.err (!%p180_p1)
}
  0x22   :  { %40 = dma.hbm_to_vmem [thread:$0]  %s286_s1, 128, %s38_s30, [#allocation6]  }
  0x23   :  { %206 = dma.done.wait [#allocation3], 512  }
  0x24   :  { %207 = vsyncadd [#allocation3], 4294966784 }
  0x25   :  { %208 = dma.done.wait [#allocation6], 128  }
  0x26   :  { %209 = vsyncadd [#allocation6], 4294967168  ;;  %v70_v0 = vlaneseq  ;;  %v216_v1 = vmov 0.0   ;;  %v63_v3 = vld [vmem:[#allocation5] sm:$0xff]  ;;  %v60_v14 = vld [vmem:[#allocation2 + $0x8] sm:$0xff] }
  0x27   :  { %58 = vst [vmem:[#allocation7] sm:$0xff] %v216_v1  ;;  %v68_v4 = vld [vmem:[%s287_s2] sm:$0x1]  ;;  %v64_v6 = vunpack.c.0.s8 %v63_v3  ;;  %v65_v7 = vunpack.c.1.s8 %v63_v3  ;;  %v66_v8 = vunpack.c.2.s8 %v63_v3  ;;  %v67_v9 = vunpack.c.3.s8 %v63_v3  ;;  %v61_v15 = vld [vmem:[#allocation2 + $0x10] sm:$0xff]  ;;  %v62_v16 = vld [vmem:[#allocation2 + $0x18] sm:$0xff]  ;;  %s217_s2 = smov [#allocation7]  }
  0x28   :  { %v71_v2 = vshrl.u32 %v70_v0, 7  ;;  %v69_v10 = vunpack.c.0.s8 %v68_v4  ;;  %v133_v12 = vld [vmem:[%s288_s3] ss:$0 sm:$0xff]  ;;  %s123_s3 = sshll.u32 %s217_s2, 4  ;;  %s124_s3 = int_to_ptr.vmem [resolvable:$true] %s123_s3 }
  0x29   :  { %v59_v13 = vld [vmem:[#allocation2] sm:$0xff]  ;;  %s184_s17 = scalar_lea.vmem %s124_s3, 128  ;;  %p189_p3 = scmp.lt.s32.totalorder %s124_s3, %s124_s3 }
  0x2a   :  { %v72_v5 = vsub.s32 0, %v71_v2  ;;  %p185_p2 = scmp.ne.s32.totalorder %s124_s3, %s184_s17  ;;  %p190_p4 = scmp.lt.s32.totalorder %s184_s17, %s184_s17 }
  0x2c   :  { %v73_v11 = vrot.slane %v69_v10, %v72_v5  ;;  %p191_p5 = por %p190_p4, %p189_p3 }
  0x2e   :  { %vm74_vm0 = vcmp.eq.s32.totalorder %v64_v6, %v73_v11  ;;  %vm75_vm1 = vcmp.eq.s32.totalorder %v65_v7, %v73_v11  ;;  %vm76_vm2 = vcmp.eq.s32.totalorder %v66_v8, %v73_v11  ;;  %vm77_vm3 = vcmp.eq.s32.totalorder %v67_v9, %v73_v11  ;;  %v105_v41 = vld [vmem:[#allocation7 + $0x1] sm:$0x1]  ;;  %v89_v42 = vld [vmem:[#allocation7] sm:$0x1]  ;;  %p192_p6 = pnand %p191_p5, %p185_p2 }
  0x2f   :  { %v85_v17 = vsel %vm74_vm0, %v133_v12, 0.0  ;;  %v86_v18 = vsel %vm75_vm1, %v133_v12, 0.0  ;;  %v87_v19 = vsel %vm76_vm2, %v133_v12, 0.0  ;;  %v88_v20 = vsel %vm77_vm3, %v133_v12, 0.0 }
  0x30   :  { %v90_v21 = vmul.f32 %v85_v17, %v59_v13  ;;  %v91_v22 = vmul.f32 %v86_v18, %v60_v14  ;;  %v92_v23 = vmul.f32 %v87_v19, %v61_v15  ;;  %v106_v24 = vadd.f32 %v86_v18, %v85_v17 }
  0x31   :  { %v93_v25 = vmul.f32 %v88_v20, %v62_v16 }
  0x32   :  { %v94_v26 = vadd.f32 %v91_v22, %v90_v21  ;;  %v107_v27 = vadd.f32 %v106_v24, %v87_v19 }
  0x34   :  { %v95_v28 = vadd.f32 %v94_v26, %v92_v23  ;;  %v108_v29 = vadd.f32 %v107_v27, %v88_v20 }
  0x36   :  { %v96_v30 = vadd.f32 %v95_v28, %v93_v25  ;;  %v109_v31 = vrot.slane %v108_v29, 4 }
  0x38   :  { %v97_v32 = vrot.slane %v96_v30, 4  ;;  %v110_v33 = vadd.f32 %v109_v31, %v108_v29 }
  0x3a   :  { %v98_v34 = vadd.f32 %v97_v32, %v96_v30  ;;  %v111_v35 = vrot.slane %v110_v33, 2 }
  0x3c   :  { %v99_v36 = vrot.slane %v98_v34, 2  ;;  %v112_v37 = vadd.f32 %v111_v35, %v110_v33 }
  0x3e   :  { %v100_v38 = vadd.f32 %v99_v36, %v98_v34  ;;  %v113_v39 = vrot.slane %v112_v37, 1 }
  0x40   :  { %v101_v40 = vrot.slane %v100_v38, 1  ;;  %v114_v43 = vadd.f32 %v113_v39, %v112_v37 }
  0x42   :  { %v102_v44 = vadd.f32 %v101_v40, %v100_v38  ;;  %v115_v45 = vadd.f32 %v114_v43, %v105_v41 }
  0x44   :  { %v103_v46 = vadd.f32 %v102_v44, %v89_v42  ;;  %116 = vst [vmem:[#allocation7 + $0x1] sm:$0x1] %v115_v45 }
  0x46   :  { %104 = vst [vmem:[#allocation7] sm:$0x1] %v103_v46 }
  0x47   :  { %195 = shalt.err (!%p192_p6)
}
  0x48   :  { %s196_s20 = scalar_lea.hbm %s289_s4, 128 }
  0x49   :  { %p197_p7 = scmp.ne.s32.totalorder %s289_s4, %s196_s20  ;;  %p200_p8 = scmp.lt.u32.totalorder %s196_s20, %s289_s4 }
  0x4b   :  { %p202_p9 = pnand %p200_p8, %p197_p7 }
  0x4d   :  { %205 = shalt.err (!%p202_p9)
}
  0x4e   :  { %126 = dma.vmem_to_hbm [thread:$0]  %s124_s3, 128, %s289_s4, [#allocation4]  }
  0x4f   :  { %210 = dma.done.wait [#allocation4], 128  }
  0x50   :  { %211 = vsyncadd [#allocation4], 4294967168 }
  0x51   :  { %130 = vsyncpa [#allocation3], 1 }
  0x52   :  { %131 = vsyncpa [#allocation6], 1 }
  0x53   :  { %132 = vsyncpa [#allocation4], 1 }

</bundles_post_ra>
